<compile_context>
chip_gen: v7x
topology: tpu7x:2x2x1
jax: 0.10.0
libtpu: 0.0.40
codegen_flags: <defaults>
</compile_context>

<pallas_src>
import jax
import jax.numpy as jnp
from jax import lax
from jax.experimental import pallas as pl
from jax.experimental.pallas import tpu as pltpu

MXU_DTYPE = jnp.bfloat16      # GEMM operand dtype (accumulation is always f32)
CONV_TILE_M = 4096            # lane-dim tile for conv kernels (multiple of 128)
FC_TILE_B = 1024              # row-dim tile for the FC kernel (multiple of 8)


# ----------------------------- Pallas kernels -----------------------------

def _conv_relu_pool_kernel(p_ref, w_ref, b_ref, o_ref):
    """Fused conv (as GEMM) + 2x2 max-pool + bias + ReLU.

    p_ref: [4, K, tm]  phase-wise transposed im2col patches
    w_ref: [OC, K]     flattened conv weight
    b_ref: [OC, 1]     bias (f32)
    o_ref: [OC, tm]    pooled activation (lane-dense along M = B*OH*OW)
    """
    w = w_ref[...]
    acc = jnp.dot(w, p_ref[0], preferred_element_type=jnp.float32)
    for ph in range(1, p_ref.shape[0]):            # max over the 2x2 pool phases
        acc = jnp.maximum(
            acc, jnp.dot(w, p_ref[ph], preferred_element_type=jnp.float32))
    y = jnp.maximum(acc + b_ref[...], 0.0)         # bias + ReLU in f32
    o_ref[...] = y.astype(o_ref.dtype)


def _fc_stack_kernel(x_ref, w1_ref, b1_ref, w2_ref, b2_ref, w3_ref, b3_ref,
                     o_ref):
    """fc1+ReLU -> fc2+ReLU -> fc3 -> log_softmax; intermediates stay on-chip."""
    h = x_ref[...]
    h = jnp.maximum(
        jnp.dot(h, w1_ref[...], preferred_element_type=jnp.float32) + b1_ref[...],
        0.0)
    h = h.astype(w2_ref.dtype)
    h = jnp.maximum(
        jnp.dot(h, w2_ref[...], preferred_element_type=jnp.float32) + b2_ref[...],
        0.0)
    h = h.astype(w3_ref.dtype)
    z = jnp.dot(h, w3_ref[...], preferred_element_type=jnp.float32) + b3_ref[...]
    m = jnp.max(z, axis=-1, keepdims=True)
    lse = jnp.log(jnp.sum(jnp.exp(z - m), axis=-1, keepdims=True)) + m
    o_ref[...] = (z - lse).astype(o_ref.dtype)


# ----------------------------- pallas_call wrappers -----------------------------

def _conv_relu_pool(patches, w, b):
    """patches: [4, K, M], w: [OC, K], b: [OC, 1] -> [OC, M] pooled/ReLU'd."""
    P, K, M = patches.shape
    OC = w.shape[0]
    tm = M if M <= CONV_TILE_M else CONV_TILE_M
    grid = (pl.cdiv(M, tm),)
    return pl.pallas_call(
        _conv_relu_pool_kernel,
        out_shape=jax.ShapeDtypeStruct((OC, M), w.dtype),
        grid_spec=pltpu.PrefetchScalarGridSpec(
            num_scalar_prefetch=0,
            grid=grid,
            in_specs=[pl.BlockSpec((P, K, tm), lambda m: (0, 0, m)),
                      pl.BlockSpec((OC, K), lambda m: (0, 0)),
                      pl.BlockSpec((OC, 1), lambda m: (0, 0))],
            out_specs=pl.BlockSpec((OC, tm), lambda m: (0, m))),
        compiler_params=pltpu.CompilerParams(
            dimension_semantics=("parallel",)),
    )(patches, w, b)


def _fc_stack(feat, w1, b1, w2, b2, w3, b3):
    Bn, K = feat.shape
    NC = w3.shape[1]
    tb = Bn if Bn <= FC_TILE_B else FC_TILE_B
    grid = (pl.cdiv(Bn, tb),)

    def const(shape):
        return pl.BlockSpec(shape, lambda i: (0, 0))

    return pl.pallas_call(
        _fc_stack_kernel,
        out_shape=jax.ShapeDtypeStruct((Bn, NC), jnp.float32),
        grid_spec=pltpu.PrefetchScalarGridSpec(
            num_scalar_prefetch=0,
            grid=grid,
            in_specs=[pl.BlockSpec((tb, K), lambda i: (i, 0)),
                      const(w1.shape), const(b1.shape),
                      const(w2.shape), const(b2.shape),
                      const(w3.shape), const(b3.shape)],
            out_specs=pl.BlockSpec((tb, NC), lambda i: (i, 0))),
        compiler_params=pltpu.CompilerParams(
            dimension_semantics=("parallel",)),
    )(feat, w1, b1, w2, b2, w3, b3)


# ----------------------------- XLA glue: phase-wise im2col -----------------------------

def _phase_patches(x, kh, kw, ph_out, pw_out):
    """Transposed im2col for (stride-1 valid conv -> 2x2 max-pool), per pool phase.

    x: [C, B, H, W] channels-first.
    Returns [4, C*kh*kw, B*ph_out*pw_out] where phase (di,dj), row (ic,u,v),
    column (b,i,j) holds x[ic, b, 2i+di+u, 2j+dj+v].
    """
    C, B = x.shape[0], x.shape[1]
    sh, sw = 2 * ph_out, 2 * pw_out
    phases = []
    for di in (0, 1):
        for dj in (0, 1):
            slabs = [x[:, :, di + u: di + u + sh: 2, dj + v: dj + v + sw: 2]
                     for u in range(kh) for v in range(kw)]   # each [C, B, ph, pw]
            phases.append(
                jnp.stack(slabs, axis=1).reshape(C * kh * kw,
                                                 B * ph_out * pw_out))
    return jnp.stack(phases, axis=0)


# ----------------------------- model -----------------------------

def init_params(num_classes, key):
    def dense(k, fan_in, shape):
        return jax.random.normal(k, shape, jnp.float32) / jnp.sqrt(fan_in)

    ks = jax.random.split(key, 10)
    return {
        "conv1_w": dense(ks[0], 25, (4, 1, 5, 5)),
        "conv1_b": dense(ks[1], 25, (4,)),
        "conv2_w": dense(ks[2], 100, (12, 4, 5, 5)),
        "conv2_b": dense(ks[3], 100, (12,)),
        "fc1_w":   dense(ks[4], 192, (120, 192)),
        "fc1_b":   dense(ks[5], 192, (120,)),
        "fc2_w":   dense(ks[6], 120, (100, 120)),
        "fc2_b":   dense(ks[7], 120, (100,)),
        "fc3_w":   dense(ks[8], 100, (num_classes, 100)),
        "fc3_b":   dense(ks[9], 100, (num_classes,)),
    }


@jax.jit
def cnn_femnist_forward(params, x):
    """x: [B, 1, 28, 28] f32 -> [B, num_classes] log-probs (f32)."""
    B, IC, H, W = x.shape
    OC1 = params["conv1_w"].shape[0]
    OC2 = params["conv2_w"].shape[0]
    PH1, PW1 = (H - 4) // 2, (W - 4) // 2        # 12, 12
    PH2, PW2 = (PH1 - 4) // 2, (PW1 - 4) // 2    # 4, 4

    # weight prep (tiny; constant-folded under jit)
    w1 = params["conv1_w"].reshape(OC1, IC * 25).astype(MXU_DTYPE)
    b1 = params["conv1_b"].reshape(OC1, 1).astype(jnp.float32)
    w2 = params["conv2_w"].reshape(OC2, OC1 * 25).astype(MXU_DTYPE)
    b2 = params["conv2_b"].reshape(OC2, 1).astype(jnp.float32)
    wf1 = params["fc1_w"].T.astype(MXU_DTYPE)
    bf1 = params["fc1_b"].reshape(1, -1).astype(jnp.float32)
    wf2 = params["fc2_w"].T.astype(MXU_DTYPE)
    bf2 = params["fc2_b"].reshape(1, -1).astype(jnp.float32)
    wf3 = params["fc3_w"].T.astype(MXU_DTYPE)
    bf3 = params["fc3_b"].reshape(1, -1).astype(jnp.float32)

    # stage 1: conv1 + ReLU + 2x2 pool (one fused kernel)
    xc = x.transpose(1, 0, 2, 3).astype(MXU_DTYPE)             # [1, B, 28, 28]
    p1 = _phase_patches(xc, 5, 5, PH1, PW1)                    # [4, 25, B*144]
    a1 = _conv_relu_pool(p1, w1, b1)                           # [4, B*144]
    a1 = a1.reshape(OC1, B, PH1, PW1)                          # channels-first

    # stage 2: conv2 + ReLU + 2x2 pool (one fused kernel)
    p2 = _phase_patches(a1, 5, 5, PH2, PW2)                    # [4, 100, B*16]
    a2 = _conv_relu_pool(p2, w2, b2)                           # [12, B*16]

    # stage 3: flatten in torch (C, H, W) order + fused FC stack
    feat = (a2.reshape(OC2, B, PH2, PW2)
              .transpose(1, 0, 2, 3)
              .reshape(B, OC2 * PH2 * PW2))                    # [B, 192]
    return _fc_stack(feat, wf1, bf1, wf2, bf2, wf3, bf3)       # [B, NC] log-probs


@jax.jit
def reference_forward(params, x):
    """Pure-JAX f32 reference matching the PyTorch module exactly."""
    def conv_relu(y, w, b):
        y = lax.conv_general_dilated(
            y, w, (1, 1), "VALID",
            dimension_numbers=("NCHW", "OIHW", "NCHW"))
        return jax.nn.relu(y + b[None, :, None, None])

    def pool(y):
        b, c, h, w = y.shape
        return jnp.max(y.reshape(b, c, h // 2, 2, w // 2, 2), axis=(3, 5))

    y = pool(conv_relu(x, params["conv1_w"], params["conv1_b"]))
    y = pool(conv_relu(y, params["conv2_w"], params["conv2_b"]))
    y = y.reshape(y.shape[0], -1)
    y = jax.nn.relu(y @ params["fc1_w"].T + params["fc1_b"])
    y = jax.nn.relu(y @ params["fc2_w"].T + params["fc2_b"])
    z = y @ params["fc3_w"].T + params["fc3_b"]
    return jax.nn.log_softmax(z, axis=1)


if __name__ == "__main__":
    NUM_CLASSES = 10
    key = jax.random.PRNGKey(0)
    k_param, k_x = jax.random.split(key)

    params = init_params(NUM_CLASSES, k_param)
    x = jax.random.normal(k_x, (2, 1, 28, 28), jnp.float32)    # FEMNIST-shaped input

    out = jax.block_until_ready(cnn_femnist_forward(params, x))
    ref = jax.block_until_ready(reference_forward(params, x))

    assert out.shape == (2, NUM_CLASSES)
    # log_softmax rows must exponentiate-sum to 1
    assert jnp.allclose(jnp.sum(jnp.exp(out), axis=1), 1.0, atol=1e-3)
    # matches the f32 reference up to bf16-MXU operand rounding
    err = float(jnp.max(jnp.abs(out - ref)))
    assert err < 0.15, f"max |pallas - reference| = {err}"
    print("KERNEL_OK")
</pallas_src>

<mosaic_0001>
module attributes {stable_mosaic.version = 11 : i64} {
  func.func @_conv_relu_pool_kernel(%arg0: i32, %arg1: memref<4x25x288xbf16, #tpu.memory_space<vmem>>, %arg2: memref<4x25xbf16, #tpu.memory_space<vmem>>, %arg3: memref<4x1xf32, #tpu.memory_space<vmem>>, %arg4: memref<4x288xbf16, #tpu.memory_space<vmem>>) attributes {dimension_semantics = [#tpu.dimension_semantics<parallel>], iteration_bounds = array<i64: 1>, scalar_prefetch = 0 : i64, scratch_operands = 0 : i64, tpu.core_type = #tpu.core_type<tc>, window_params = [{transform_indices = @transform_0, window_bounds = array<i64: 4, 25, 288>}, {pipeline_mode = #tpu.pipeline_mode<synchronous>, transform_indices = @transform_1, window_bounds = array<i64: 4, 25>}, {pipeline_mode = #tpu.pipeline_mode<synchronous>, transform_indices = @transform_2, window_bounds = array<i64: 4, 1>}, {transform_indices = @transform_3, window_bounds = array<i64: 4, 288>}]} {
    %c0 = arith.constant 0 : index
    %c0_0 = arith.constant 0 : index
    %0 = vector.load %arg2[%c0, %c0_0] : memref<4x25xbf16, #tpu.memory_space<vmem>>, vector<4x25xbf16>
    %c0_1 = arith.constant 0 : index
    %c0_2 = arith.constant 0 : index
    %c0_3 = arith.constant 0 : index
    %1 = vector.load %arg1[%c0_1, %c0_2, %c0_3] : memref<4x25x288xbf16, #tpu.memory_space<vmem>>, vector<1x25x288xbf16>
    %2 = vector.shape_cast %1 : vector<1x25x288xbf16> to vector<25x288xbf16>
    %cst = arith.constant dense<0.000000e+00> : vector<4x288xf32>
    %3 = tpu.matmul %0, %2, %cst {dimension_numbers = #tpu.dot_dimension_numbers<[1], [0], [0], [1], [0, 0, 1, 1], [], []>} : vector<4x25xbf16>, vector<25x288xbf16>, vector<4x288xf32> -> vector<4x288xf32>
    %c1 = arith.constant 1 : index
    %c0_4 = arith.constant 0 : index
    %c0_5 = arith.constant 0 : index
    %4 = vector.load %arg1[%c1, %c0_4, %c0_5] : memref<4x25x288xbf16, #tpu.memory_space<vmem>>, vector<1x25x288xbf16>
    %5 = vector.shape_cast %4 : vector<1x25x288xbf16> to vector<25x288xbf16>
    %cst_6 = arith.constant dense<0.000000e+00> : vector<4x288xf32>
    %6 = tpu.matmul %0, %5, %cst_6 {dimension_numbers = #tpu.dot_dimension_numbers<[1], [0], [0], [1], [0, 0, 1, 1], [], []>} : vector<4x25xbf16>, vector<25x288xbf16>, vector<4x288xf32> -> vector<4x288xf32>
    %7 = arith.maximumf %3, %6 : vector<4x288xf32>
    %c2 = arith.constant 2 : index
    %c0_7 = arith.constant 0 : index
    %c0_8 = arith.constant 0 : index
    %8 = vector.load %arg1[%c2, %c0_7, %c0_8] : memref<4x25x288xbf16, #tpu.memory_space<vmem>>, vector<1x25x288xbf16>
    %9 = vector.shape_cast %8 : vector<1x25x288xbf16> to vector<25x288xbf16>
    %cst_9 = arith.constant dense<0.000000e+00> : vector<4x288xf32>
    %10 = tpu.matmul %0, %9, %cst_9 {dimension_numbers = #tpu.dot_dimension_numbers<[1], [0], [0], [1], [0, 0, 1, 1], [], []>} : vector<4x25xbf16>, vector<25x288xbf16>, vector<4x288xf32> -> vector<4x288xf32>
    %11 = arith.maximumf %7, %10 : vector<4x288xf32>
    %c3 = arith.constant 3 : index
    %c0_10 = arith.constant 0 : index
    %c0_11 = arith.constant 0 : index
    %12 = vector.load %arg1[%c3, %c0_10, %c0_11] : memref<4x25x288xbf16, #tpu.memory_space<vmem>>, vector<1x25x288xbf16>
    %13 = vector.shape_cast %12 : vector<1x25x288xbf16> to vector<25x288xbf16>
    %cst_12 = arith.constant dense<0.000000e+00> : vector<4x288xf32>
    %14 = tpu.matmul %0, %13, %cst_12 {dimension_numbers = #tpu.dot_dimension_numbers<[1], [0], [0], [1], [0, 0, 1, 1], [], []>} : vector<4x25xbf16>, vector<25x288xbf16>, vector<4x288xf32> -> vector<4x288xf32>
    %15 = arith.maximumf %11, %14 : vector<4x288xf32>
    %c0_13 = arith.constant 0 : index
    %c0_14 = arith.constant 0 : index
    %16 = vector.load %arg3[%c0_13, %c0_14] : memref<4x1xf32, #tpu.memory_space<vmem>>, vector<4x1xf32>
    %17 = vector.broadcast %16 : vector<4x1xf32> to vector<4x288xf32>
    %18 = arith.addf %15, %17 : vector<4x288xf32>
    %cst_15 = arith.constant 0.000000e+00 : f32
    %19 = vector.broadcast %cst_15 : f32 to vector<4x288xf32>
    %20 = arith.maximumf %18, %19 : vector<4x288xf32>
    %21 = arith.truncf %20 : vector<4x288xf32> to vector<4x288xbf16>
    %c0_16 = arith.constant 0 : index
    %c0_17 = arith.constant 0 : index
    %22 = vector.load %arg4[%c0_16, %c0_17] : memref<4x288xbf16, #tpu.memory_space<vmem>>, vector<4x288xbf16>
    tpu.vector_store %arg4[%c0_16, %c0_17], %21 {strides = array<i32>} : memref<4x288xbf16, #tpu.memory_space<vmem>>, vector<4x288xbf16>,
    return
  }
  func.func @transform_0(%arg0: i32) -> (i32, i32, i32) {
    %c0_i32 = arith.constant 0 : i32
    %c0_i32_0 = arith.constant 0 : i32
    %c0_i32_1 = arith.constant 0 : i32
    return %c0_i32, %c0_i32_0, %arg0 : i32, i32, i32
  }
  func.func @transform_1(%arg0: i32) -> (i32, i32) {
    %c0_i32 = arith.constant 0 : i32
    %c0_i32_0 = arith.constant 0 : i32
    %c0_i32_1 = arith.constant 0 : i32
    return %c0_i32, %c0_i32_0 : i32, i32
  }
  func.func @transform_2(%arg0: i32) -> (i32, i32) {
    %c0_i32 = arith.constant 0 : i32
    %c0_i32_0 = arith.constant 0 : i32
    %c0_i32_1 = arith.constant 0 : i32
    return %c0_i32, %c0_i32_0 : i32, i32
  }
  func.func @transform_3(%arg0: i32) -> (i32, i32) {
    %c0_i32 = arith.constant 0 : i32
    %c0_i32_0 = arith.constant 0 : i32
    return %c0_i32, %arg0 : i32, i32
  }
}

module attributes {stable_mosaic.version = 11 : i64} {
  func.func @_conv_relu_pool_kernel(%arg0: i32, %arg1: memref<4x100x32xbf16, #tpu.memory_space<vmem>>, %arg2: memref<12x100xbf16, #tpu.memory_space<vmem>>, %arg3: memref<12x1xf32, #tpu.memory_space<vmem>>, %arg4: memref<12x32xbf16, #tpu.memory_space<vmem>>) attributes {dimension_semantics = [#tpu.dimension_semantics<parallel>], iteration_bounds = array<i64: 1>, scalar_prefetch = 0 : i64, scratch_operands = 0 : i64, tpu.core_type = #tpu.core_type<tc>, window_params = [{transform_indices = @transform_0, window_bounds = array<i64: 4, 100, 32>}, {pipeline_mode = #tpu.pipeline_mode<synchronous>, transform_indices = @transform_1, window_bounds = array<i64: 12, 100>}, {pipeline_mode = #tpu.pipeline_mode<synchronous>, transform_indices = @transform_2, window_bounds = array<i64: 12, 1>}, {transform_indices = @transform_3, window_bounds = array<i64: 12, 32>}]} {
    %c0 = arith.constant 0 : index
    %c0_0 = arith.constant 0 : index
    %0 = vector.load %arg2[%c0, %c0_0] : memref<12x100xbf16, #tpu.memory_space<vmem>>, vector<12x100xbf16>
    %c0_1 = arith.constant 0 : index
    %c0_2 = arith.constant 0 : index
    %c0_3 = arith.constant 0 : index
    %1 = vector.load %arg1[%c0_1, %c0_2, %c0_3] : memref<4x100x32xbf16, #tpu.memory_space<vmem>>, vector<1x100x32xbf16>
    %2 = vector.shape_cast %1 : vector<1x100x32xbf16> to vector<100x32xbf16>
    %cst = arith.constant dense<0.000000e+00> : vector<12x32xf32>
    %3 = tpu.matmul %0, %2, %cst {dimension_numbers = #tpu.dot_dimension_numbers<[1], [0], [0], [1], [0, 0, 1, 1], [], []>} : vector<12x100xbf16>, vector<100x32xbf16>, vector<12x32xf32> -> vector<12x32xf32>
    %c1 = arith.constant 1 : index
    %c0_4 = arith.constant 0 : index
    %c0_5 = arith.constant 0 : index
    %4 = vector.load %arg1[%c1, %c0_4, %c0_5] : memref<4x100x32xbf16, #tpu.memory_space<vmem>>, vector<1x100x32xbf16>
    %5 = vector.shape_cast %4 : vector<1x100x32xbf16> to vector<100x32xbf16>
    %cst_6 = arith.constant dense<0.000000e+00> : vector<12x32xf32>
    %6 = tpu.matmul %0, %5, %cst_6 {dimension_numbers = #tpu.dot_dimension_numbers<[1], [0], [0], [1], [0, 0, 1, 1], [], []>} : vector<12x100xbf16>, vector<100x32xbf16>, vector<12x32xf32> -> vector<12x32xf32>
    %7 = arith.maximumf %3, %6 : vector<12x32xf32>
    %c2 = arith.constant 2 : index
    %c0_7 = arith.constant 0 : index
    %c0_8 = arith.constant 0 : index
    %8 = vector.load %arg1[%c2, %c0_7, %c0_8] : memref<4x100x32xbf16, #tpu.memory_space<vmem>>, vector<1x100x32xbf16>
    %9 = vector.shape_cast %8 : vector<1x100x32xbf16> to vector<100x32xbf16>
    %cst_9 = arith.constant dense<0.000000e+00> : vector<12x32xf32>
    %10 = tpu.matmul %0, %9, %cst_9 {dimension_numbers = #tpu.dot_dimension_numbers<[1], [0], [0], [1], [0, 0, 1, 1], [], []>} : vector<12x100xbf16>, vector<100x32xbf16>, vector<12x32xf32> -> vector<12x32xf32>
    %11 = arith.maximumf %7, %10 : vector<12x32xf32>
    %c3 = arith.constant 3 : index
    %c0_10 = arith.constant 0 : index
    %c0_11 = arith.constant 0 : index
    %12 = vector.load %arg1[%c3, %c0_10, %c0_11] : memref<4x100x32xbf16, #tpu.memory_space<vmem>>, vector<1x100x32xbf16>
    %13 = vector.shape_cast %12 : vector<1x100x32xbf16> to vector<100x32xbf16>
    %cst_12 = arith.constant dense<0.000000e+00> : vector<12x32xf32>
    %14 = tpu.matmul %0, %13, %cst_12 {dimension_numbers = #tpu.dot_dimension_numbers<[1], [0], [0], [1], [0, 0, 1, 1], [], []>} : vector<12x100xbf16>, vector<100x32xbf16>, vector<12x32xf32> -> vector<12x32xf32>
    %15 = arith.maximumf %11, %14 : vector<12x32xf32>
    %c0_13 = arith.constant 0 : index
    %c0_14 = arith.constant 0 : index
    %16 = vector.load %arg3[%c0_13, %c0_14] : memref<12x1xf32, #tpu.memory_space<vmem>>, vector<12x1xf32>
    %17 = vector.broadcast %16 : vector<12x1xf32> to vector<12x32xf32>
    %18 = arith.addf %15, %17 : vector<12x32xf32>
    %cst_15 = arith.constant 0.000000e+00 : f32
    %19 = vector.broadcast %cst_15 : f32 to vector<12x32xf32>
    %20 = arith.maximumf %18, %19 : vector<12x32xf32>
    %21 = arith.truncf %20 : vector<12x32xf32> to vector<12x32xbf16>
    %c0_16 = arith.constant 0 : index
    %c0_17 = arith.constant 0 : index
    %22 = vector.load %arg4[%c0_16, %c0_17] : memref<12x32xbf16, #tpu.memory_space<vmem>>, vector<12x32xbf16>
    tpu.vector_store %arg4[%c0_16, %c0_17], %21 {strides = array<i32>} : memref<12x32xbf16, #tpu.memory_space<vmem>>, vector<12x32xbf16>,
    return
  }
  func.func @transform_0(%arg0: i32) -> (i32, i32, i32) {
    %c0_i32 = arith.constant 0 : i32
    %c0_i32_0 = arith.constant 0 : i32
    %c0_i32_1 = arith.constant 0 : i32
    return %c0_i32, %c0_i32_0, %arg0 : i32, i32, i32
  }
  func.func @transform_1(%arg0: i32) -> (i32, i32) {
    %c0_i32 = arith.constant 0 : i32
    %c0_i32_0 = arith.constant 0 : i32
    %c0_i32_1 = arith.constant 0 : i32
    return %c0_i32, %c0_i32_0 : i32, i32
  }
  func.func @transform_2(%arg0: i32) -> (i32, i32) {
    %c0_i32 = arith.constant 0 : i32
    %c0_i32_0 = arith.constant 0 : i32
    %c0_i32_1 = arith.constant 0 : i32
    return %c0_i32, %c0_i32_0 : i32, i32
  }
  func.func @transform_3(%arg0: i32) -> (i32, i32) {
    %c0_i32 = arith.constant 0 : i32
    %c0_i32_0 = arith.constant 0 : i32
    return %c0_i32, %arg0 : i32, i32
  }
}

module attributes {stable_mosaic.version = 11 : i64} {
  func.func @_fc_stack_kernel(%arg0: i32, %arg1: memref<2x192xbf16, #tpu.memory_space<vmem>>, %arg2: memref<192x120xbf16, #tpu.memory_space<vmem>>, %arg3: memref<1x120xf32, #tpu.memory_space<vmem>>, %arg4: memref<120x100xbf16, #tpu.memory_space<vmem>>, %arg5: memref<1x100xf32, #tpu.memory_space<vmem>>, %arg6: memref<100x10xbf16, #tpu.memory_space<vmem>>, %arg7: memref<1x10xf32, #tpu.memory_space<vmem>>, %arg8: memref<2x10xf32, #tpu.memory_space<vmem>>) attributes {dimension_semantics = [#tpu.dimension_semantics<parallel>], iteration_bounds = array<i64: 1>, scalar_prefetch = 0 : i64, scratch_operands = 0 : i64, tpu.core_type = #tpu.core_type<tc>, window_params = [{transform_indices = @transform_0, window_bounds = array<i64: 2, 192>}, {pipeline_mode = #tpu.pipeline_mode<synchronous>, transform_indices = @transform_1, window_bounds = array<i64: 192, 120>}, {pipeline_mode = #tpu.pipeline_mode<synchronous>, transform_indices = @transform_2, window_bounds = array<i64: 1, 120>}, {pipeline_mode = #tpu.pipeline_mode<synchronous>, transform_indices = @transform_3, window_bounds = array<i64: 120, 100>}, {pipeline_mode = #tpu.pipeline_mode<synchronous>, transform_indices = @transform_4, window_bounds = array<i64: 1, 100>}, {pipeline_mode = #tpu.pipeline_mode<synchronous>, transform_indices = @transform_5, window_bounds = array<i64: 100, 10>}, {pipeline_mode = #tpu.pipeline_mode<synchronous>, transform_indices = @transform_6, window_bounds = array<i64: 1, 10>}, {transform_indices = @transform_7, window_bounds = array<i64: 2, 10>}]} {
    %c0 = arith.constant 0 : index
    %c0_0 = arith.constant 0 : index
    %0 = vector.load %arg1[%c0, %c0_0] : memref<2x192xbf16, #tpu.memory_space<vmem>>, vector<2x192xbf16>
    %c0_1 = arith.constant 0 : index
    %c0_2 = arith.constant 0 : index
    %1 = vector.load %arg2[%c0_1, %c0_2] : memref<192x120xbf16, #tpu.memory_space<vmem>>, vector<192x120xbf16>
    %cst = arith.constant dense<0.000000e+00> : vector<2x120xf32>
    %2 = tpu.matmul %0, %1, %cst {dimension_numbers = #tpu.dot_dimension_numbers<[1], [0], [0], [1], [0, 0, 1, 1], [], []>} : vector<2x192xbf16>, vector<192x120xbf16>, vector<2x120xf32> -> vector<2x120xf32>
    %c0_3 = arith.constant 0 : index
    %c0_4 = arith.constant 0 : index
    %3 = vector.load %arg3[%c0_3, %c0_4] : memref<1x120xf32, #tpu.memory_space<vmem>>, vector<1x120xf32>
    %4 = vector.broadcast %3 : vector<1x120xf32> to vector<2x120xf32>
    %5 = arith.addf %2, %4 : vector<2x120xf32>
    %cst_5 = arith.constant 0.000000e+00 : f32
    %6 = vector.broadcast %cst_5 : f32 to vector<2x120xf32>
    %7 = arith.maximumf %5, %6 : vector<2x120xf32>
    %8 = arith.truncf %7 : vector<2x120xf32> to vector<2x120xbf16>
    %c0_6 = arith.constant 0 : index
    %c0_7 = arith.constant 0 : index
    %9 = vector.load %arg4[%c0_6, %c0_7] : memref<120x100xbf16, #tpu.memory_space<vmem>>, vector<120x100xbf16>
    %cst_8 = arith.constant dense<0.000000e+00> : vector<2x100xf32>
    %10 = tpu.matmul %8, %9, %cst_8 {dimension_numbers = #tpu.dot_dimension_numbers<[1], [0], [0], [1], [0, 0, 1, 1], [], []>} : vector<2x120xbf16>, vector<120x100xbf16>, vector<2x100xf32> -> vector<2x100xf32>
    %c0_9 = arith.constant 0 : index
    %c0_10 = arith.constant 0 : index
    %11 = vector.load %arg5[%c0_9, %c0_10] : memref<1x100xf32, #tpu.memory_space<vmem>>, vector<1x100xf32>
    %12 = vector.broadcast %11 : vector<1x100xf32> to vector<2x100xf32>
    %13 = arith.addf %10, %12 : vector<2x100xf32>
    %cst_11 = arith.constant 0.000000e+00 : f32
    %14 = vector.broadcast %cst_11 : f32 to vector<2x100xf32>
    %15 = arith.maximumf %13, %14 : vector<2x100xf32>
    %16 = arith.truncf %15 : vector<2x100xf32> to vector<2x100xbf16>
    %c0_12 = arith.constant 0 : index
    %c0_13 = arith.constant 0 : index
    %17 = vector.load %arg6[%c0_12, %c0_13] : memref<100x10xbf16, #tpu.memory_space<vmem>>, vector<100x10xbf16>
    %cst_14 = arith.constant dense<0.000000e+00> : vector<2x10xf32>
    %18 = tpu.matmul %16, %17, %cst_14 {dimension_numbers = #tpu.dot_dimension_numbers<[1], [0], [0], [1], [0, 0, 1, 1], [], []>} : vector<2x100xbf16>, vector<100x10xbf16>, vector<2x10xf32> -> vector<2x10xf32>
    %c0_15 = arith.constant 0 : index
    %c0_16 = arith.constant 0 : index
    %19 = vector.load %arg7[%c0_15, %c0_16] : memref<1x10xf32, #tpu.memory_space<vmem>>, vector<1x10xf32>
    %20 = vector.broadcast %19 : vector<1x10xf32> to vector<2x10xf32>
    %21 = arith.addf %18, %20 : vector<2x10xf32>
    %cst_17 = arith.constant dense<0xFF800000> : vector<2xf32>
    %22 = vector.multi_reduction <maximumf>, %21, %cst_17 [1] : vector<2x10xf32> to vector<2xf32>
    %23 = vector.shape_cast %22 : vector<2xf32> to vector<2x1xf32>
    %24 = vector.broadcast %23 : vector<2x1xf32> to vector<2x10xf32>
    %25 = arith.subf %21, %24 : vector<2x10xf32>
    %26 = math.exp %25 : vector<2x10xf32>
    %cst_18 = arith.constant dense<0.000000e+00> : vector<2xf32>
    %27 = vector.multi_reduction <add>, %26, %cst_18 [1] : vector<2x10xf32> to vector<2xf32>
    %28 = vector.shape_cast %27 : vector<2xf32> to vector<2x1xf32>
    %29 = math.log %28 : vector<2x1xf32>
    %30 = arith.addf %29, %23 : vector<2x1xf32>
    %31 = vector.broadcast %30 : vector<2x1xf32> to vector<2x10xf32>
    %32 = arith.subf %21, %31 : vector<2x10xf32>
    %c0_19 = arith.constant 0 : index
    %c0_20 = arith.constant 0 : index
    %33 = vector.load %arg8[%c0_19, %c0_20] : memref<2x10xf32, #tpu.memory_space<vmem>>, vector<2x10xf32>
    tpu.vector_store %arg8[%c0_19, %c0_20], %32 {strides = array<i32>} : memref<2x10xf32, #tpu.memory_space<vmem>>, vector<2x10xf32>,
    return
  }
  func.func @transform_0(%arg0: i32) -> (i32, i32) {
    %c0_i32 = arith.constant 0 : i32
    %c0_i32_0 = arith.constant 0 : i32
    return %arg0, %c0_i32 : i32, i32
  }
  func.func @transform_1(%arg0: i32) -> (i32, i32) {
    %c0_i32 = arith.constant 0 : i32
    %c0_i32_0 = arith.constant 0 : i32
    %c0_i32_1 = arith.constant 0 : i32
    return %c0_i32, %c0_i32_0 : i32, i32
  }
  func.func @transform_2(%arg0: i32) -> (i32, i32) {
    %c0_i32 = arith.constant 0 : i32
    %c0_i32_0 = arith.constant 0 : i32
    %c0_i32_1 = arith.constant 0 : i32
    return %c0_i32, %c0_i32_0 : i32, i32
  }
  func.func @transform_3(%arg0: i32) -> (i32, i32) {
    %c0_i32 = arith.constant 0 : i32
    %c0_i32_0 = arith.constant 0 : i32
    %c0_i32_1 = arith.constant 0 : i32
    return %c0_i32, %c0_i32_0 : i32, i32
  }
  func.func @transform_4(%arg0: i32) -> (i32, i32) {
    %c0_i32 = arith.constant 0 : i32
    %c0_i32_0 = arith.constant 0 : i32
    %c0_i32_1 = arith.constant 0 : i32
    return %c0_i32, %c0_i32_0 : i32, i32
  }
  func.func @transform_5(%arg0: i32) -> (i32, i32) {
    %c0_i32 = arith.constant 0 : i32
    %c0_i32_0 = arith.constant 0 : i32
    %c0_i32_1 = arith.constant 0 : i32
    return %c0_i32, %c0_i32_0 : i32, i32
  }
  func.func @transform_6(%arg0: i32) -> (i32, i32) {
    %c0_i32 = arith.constant 0 : i32
    %c0_i32_0 = arith.constant 0 : i32
    %c0_i32_1 = arith.constant 0 : i32
    return %c0_i32, %c0_i32_0 : i32, i32
  }
  func.func @transform_7(%arg0: i32) -> (i32, i32) {
    %c0_i32 = arith.constant 0 : i32
    %c0_i32_0 = arith.constant 0 : i32
    return %arg0, %c0_i32 : i32, i32
  }
}

</mosaic_0001>

<bundles_post_ra>
// kernel: cnn_femnist_forward.3
= control target key start
LH: loop header
LB: loop body
LE: loop exit
PB: predicated region body
PF: predicated region fallthrough
CT: control target
= control target key end

     0   :  { %vm57_vm0 = vcmask 1043456   ;;  %vm58_vm1 = vcmask 1044480   ;;  %v728_v0 = vmov 0.0   ;;  %v729_v2 = vmov 65535   ;;  %s887_s0 = inlined_call_operand.vmem [shape: bf16[4,25,288], index: 0, kind: input, shape index: {}]   ;;  %s888_s1 = inlined_call_operand.vmem [shape: bf16[4,25], index: 1, kind: input, shape index: {}]   ;;  %s889_s2 = inlined_call_operand.vmem [shape: f32[4,1], index: 2, kind: input, shape index: {}]   ;;  %s890_s3 = inlined_call_operand.vmem [shape: bf16[4,288], index: 3, kind: output, shape index: {}]  }
   0x1   :  { %658 = vmatprep.subr.bf16.mxu1 %v728_v0  ;;  %v696_v1 = vld [vmem:[%s887_s0 + $0x4] ss:$12 sps:$4 sm:$0xff]   ;;  %v59_v3 = vsel %vm57_vm0, 4294967295, %v729_v2  ;;  %v698_v4 = vld [vmem:[%s887_s0 + $0x8] ss:$12 sps:$4 sm:$0xff]   ;;  %vm730_vm2 = vmmov 0  }
   0x2   :  { %662 = vmatprep.mubr.msk.bf16.mxu1 %vm730_vm2, %v728_v0  ;;  %70 = vmatprep.subr.bf16.mxu0 %v696_v1  ;;  %v699_v5 = vld [vmem:[%s887_s0] ss:$12 sps:$4 sm:$0xff]   ;;  %v765_v6 = vsel %vm58_vm1, %v59_v3, 0  ;;  %v700_v7 = vld [vmem:[%s887_s0 + $0x1c] ss:$12 sps:$4 sm:$0x1f]  }
   0x3   :  { %659 = vmatpush3.bf16.msra.mxu1 %v698_v4  ;;  %71 = vmatpush1.bf16.msra.mxu0 %v699_v5  ;;  %v702_v8 = vld [vmem:[%s887_s0 + $0x20] ss:$12 sps:$4 sm:$0x1f]   ;;  %v65_v9 = vand.u32 %v700_v7, %v765_v6  ;;  %v703_v10 = vld [vmem:[%s887_s0 + $0x18] ss:$12 sps:$4 sm:$0x1f]  }
   0x4   :  { %660 = vmatprep.subr.bf16.mxu1 %v728_v0  ;;  %v731_v11 = vmov 0   ;;  %v68_v12 = vand.u32 %v702_v8, %v765_v6  ;;  %v784_v13 = vld [vmem:[%s888_s1] sm:$0x3]  ;;  %vm53_vm3 = vcmask 203776   ;;  %v62_v15 = vand.u32 %v703_v10, %v765_v6  ;;  %v704_v16 = vld [vmem:[%s887_s0 + $0x30] ss:$12 sps:$4 sm:$0xff]  }
   0x5   :  { %102 = vmatprep.mubr.bf16.mxu0 %v731_v11  ;;  %695 = vset.pattern.permute.xlu0 %v731_v11  ;;  %v706_v14 = vld [vmem:[%s887_s0 + $0x34] ss:$12 sps:$4 sm:$0xff]   ;;  %v707_v17 = vld [vmem:[%s887_s0 + $0x38] ss:$12 sps:$4 sm:$0xff]   ;;  %v720_v38 = vld [vmem:[%s887_s0 + $0x90] ss:$12 sps:$4 sm:$0xff]  }
   0x6   :  { %72 = vmatprep.subr.bf16.mxu0 %v65_v9  ;;  %v708_v18 = vld [vmem:[%s887_s0 + $0x48] ss:$12 sps:$4 sm:$0x1f]   ;;  %v710_v19 = vld [vmem:[%s887_s0 + $0x4c] ss:$12 sps:$4 sm:$0x1f]  }
   0x7   :  { %661 = vmatpush3.bf16.msra.mxu1 %v68_v12  ;;  %73 = vmatpush1.bf16.msra.mxu0 %v62_v15  ;;  %v711_v20 = vld [vmem:[%s887_s0 + $0x50] ss:$12 sps:$4 sm:$0x1f]   ;;  %v193_v21 = vand.u32 %v710_v19, %v765_v6  ;;  %v190_v23 = vand.u32 %v708_v18, %v765_v6  ;;  %v715_v25 = vld [vmem:[%s887_s0 + $0x68] ss:$12 sps:$4 sm:$0xff]   ;;  %vm579_vm4 = vcmask 1041408  }
   0x8   :  { %666 = vmatprep.subr.bf16.mxu1 %v728_v0  ;;  %198 = vmatprep.subr.bf16.mxu0 %v706_v14  ;;  %v196_v22 = vand.u32 %v711_v20, %v765_v6  ;;  %v714_v24 = vld [vmem:[%s887_s0 + $0x64] ss:$12 sps:$4 sm:$0xff]   ;;  %v718_v26 = vld [vmem:[%s887_s0 + $0x7c] ss:$12 sps:$4 sm:$0x1f]   ;;  %vm580_vm5 = vcmask 1043458  }
   0x9   :  { %v716_v27 = vld [vmem:[%s887_s0 + $0x78] ss:$12 sps:$4 sm:$0x1f]   ;;  %v719_v28 = vld [vmem:[%s887_s0 + $0x80] ss:$12 sps:$4 sm:$0x1f]   ;;  %v324_v30 = vand.u32 %v718_v26, %v765_v6  ;;  %vm581_vm6 = vmor %vm580_vm5, %vm579_vm4 }
   0xa   :  { %663 = vmatmul.mubr.msk.bf16.vlgmr.msra.gmra.mrb[0].mxu1 %vm53_vm3, %v784_v13  ;;  %595 = vmatmul.mubr.msk.bf16.vlgmr.msra.gmra.mrb[0].mxu0 %vm53_vm3, %v784_v13  ;;  %v712_v29 = vld [vmem:[%s887_s0 + $0x60] ss:$12 sps:$4 sm:$0xff]   ;;  %v327_v31 = vand.u32 %v719_v28, %v765_v6  ;;  %v321_v33 = vand.u32 %v716_v27, %v765_v6  ;;  %v723_v36 = vld [vmem:[%s887_s0 + $0x98] ss:$12 sps:$4 sm:$0xff]   ;;  %v732_v9 = vmov 1983009808  }
   0xb   :  { %667 = vmatpush3.bf16.msra.mxu1 %v707_v17  ;;  %199 = vmatpush1.bf16.msra.mxu0 %v704_v16  ;;  %v544_v32 = vld [vmem:[%s889_s2] sm:$0xf]  ;;  %v726_v35 = vld [vmem:[%s887_s0 + $0xac] ss:$12 sps:$4 sm:$0x1f]   ;;  %v564_v10 = vunpack.c.l.s4 %v732_v9  ;;  %vm582_vm7 = vcmask 259076  }
   0xc   :  { %668 = vmatprep.subr.bf16.mxu1 %v728_v0  ;;  %200 = vmatprep.subr.bf16.mxu0 %v193_v21  ;;  %v722_v34 = vld [vmem:[%s887_s0 + $0x94] ss:$12 sps:$4 sm:$0xff]   ;;  %v727_v37 = vld [vmem:[%s887_s0 + $0xb0] ss:$12 sps:$4 sm:$0x1f]   ;;  %v455_v40 = vand.u32 %v726_v35, %v765_v6  ;;  %vm583_vm8 = vmor %vm582_vm7, %vm581_vm6 }
   0xd   :  { %670 = vmatprep.mubr.msk.bf16.mxu1 %vm730_vm2, %v728_v0  ;;  %230 = vmatprep.mubr.bf16.mxu0 %v731_v11  ;;  %v724_v39 = vld [vmem:[%s887_s0 + $0xa8] ss:$12 sps:$4 sm:$0x1f]   ;;  %v458_v41 = vand.u32 %v727_v37, %v765_v6  ;;  %v565_v20 = vunpack.c.0.s8 %v564_v10 }
   0xe   :  { %547 = vperm.xlu0 %695, %v544_v32   ;;  %v452_v42 = vand.u32 %v724_v39, %v765_v6 }
   0xf   :  { %669 = vmatpush3.bf16.msra.mxu1 %v196_v22  ;;  %201 = vmatpush1.bf16.msra.mxu0 %v190_v23 }
  0x10   :  { %674 = vmatprep.subr.bf16.mxu1 %v728_v0  ;;  %329 = vmatprep.subr.bf16.mxu0 %v714_v24 }
  0x12   :  { %671 = vmatmul.mubr.msk.bf16.vlgmr.msra.gmra.mrb[4].mxu1 %vm53_vm3, %v784_v13  ;;  %611 = vmatmul.mubr.msk.bf16.vlgmr.msra.gmra.mrb[4].mxu0 %vm53_vm3, %v784_v13 }
  0x13   :  { %675 = vmatpush3.bf16.msra.mxu1 %v715_v25  ;;  %330 = vmatpush1.bf16.msra.mxu0 %v712_v29 }
  0x14   :  { %676 = vmatprep.subr.bf16.mxu1 %v728_v0  ;;  %331 = vmatprep.subr.bf16.mxu0 %v324_v30 }
  0x15   :  { %678 = vmatprep.mubr.msk.bf16.mxu1 %vm730_vm2, %v728_v0  ;;  %361 = vmatprep.mubr.bf16.mxu0 %v731_v11 }
  0x17   :  { %677 = vmatpush3.bf16.msra.mxu1 %v327_v31  ;;  %332 = vmatpush1.bf16.msra.mxu0 %v321_v33 }
  0x18   :  { %682 = vmatprep.subr.bf16.mxu1 %v728_v0  ;;  %460 = vmatprep.subr.bf16.mxu0 %v722_v34 }
  0x1a   :  { %679 = vmatmul.mubr.msk.bf16.vlgmr.msra.gmra.mrb[8].mxu1 %vm53_vm3, %v784_v13  ;;  %627 = vmatmul.mubr.msk.bf16.vlgmr.msra.gmra.mrb[8].mxu0 %vm53_vm3, %v784_v13 }
  0x1b   :  { %683 = vmatpush3.bf16.msra.mxu1 %v723_v36  ;;  %461 = vmatpush1.bf16.msra.mxu0 %v720_v38 }
  0x1c   :  { %684 = vmatprep.subr.bf16.mxu1 %v728_v0  ;;  %462 = vmatprep.subr.bf16.mxu0 %v455_v40 }
  0x1d   :  { %686 = vmatprep.mubr.msk.bf16.mxu1 %vm730_vm2, %v728_v0  ;;  %492 = vmatprep.mubr.bf16.mxu0 %v731_v11  ;;  %v566_v11 = vlaneseq }
  0x1f   :  { %685 = vmatpush3.bf16.msra.mxu1 %v458_v41  ;;  %463 = vmatpush1.bf16.msra.mxu0 %v452_v42  ;;  %v567_v21 = vshrl.u32 %v566_v11, 7 }
  0x21   :  { %v568_v31 = vsub.s32 %v565_v20, %v567_v21 }
  0x22   :  { %687 = vmatmul.mubr.msk.bf16.vlgmr.msra.gmra.mrb[12].mxu1 %vm53_vm3, %v784_v13  ;;  %643 = vmatmul.mubr.msk.bf16.vlgmr.msra.gmra.mrb[12].mxu0 %vm53_vm3, %v784_v13 }
  0x8d   :  { %v548_v13 = vpop.permute.xlu0 %547 }
  0xdd   :  { %v145_v43 = vpop.f32.mrb[0].mxu1  ;;  %v104_v44 = vpop.f32.mrb[0].mxu0 }
  0xde   :  { %v664_v45 = vpop.f32.mrb[1].mxu1  ;;  %v106_v46 = vpop.f32.mrb[1].mxu0 }
  0xdf   :  { %v148_v47 = vpop.f32.mrb[2].mxu1  ;;  %v108_v48 = vpop.f32.mrb[2].mxu0 }
  0xe0   :  { %v665_v49 = vpop.f32.mrb[3].mxu1  ;;  %v109_v50 = vpop.f32.mrb[3].mxu0 }
  0xe5   :  { %v273_v51 = vpop.f32.mrb[4].mxu1  ;;  %v232_v53 = vpop.f32.mrb[4].mxu0 }
  0xe6   :  { %v281_v52 = vmax.f32 %v145_v43, %v273_v51  ;;  %v672_v54 = vpop.f32.mrb[5].mxu1  ;;  %v279_v55 = vmax.f32 %v104_v44, %v232_v53  ;;  %v234_v56 = vpop.f32.mrb[5].mxu0 }
  0xe7   :  { %v276_v57 = vpop.f32.mrb[6].mxu1  ;;  %v280_v58 = vmax.f32 %v106_v46, %v234_v56  ;;  %v236_v59 = vpop.f32.mrb[6].mxu0 }
  0xe8   :  { %v673_v60 = vpop.f32.mrb[7].mxu1  ;;  %v237_v61 = vpop.f32.mrb[7].mxu0 }
  0xed   :  { %v404_v62 = vpop.f32.mrb[8].mxu1  ;;  %v363_v0 = vpop.f32.mrb[8].mxu0 }
  0xee   :  { %v412_v63 = vmax.f32 %v281_v52, %v404_v62  ;;  %v680_v1 = vpop.f32.mrb[9].mxu1  ;;  %v410_v2 = vmax.f32 %v279_v55, %v363_v0  ;;  %v365_v3 = vpop.f32.mrb[9].mxu0 }
  0xef   :  { %v407_v4 = vpop.f32.mrb[10].mxu1  ;;  %v411_v5 = vmax.f32 %v280_v58, %v365_v3  ;;  %v367_v6 = vpop.f32.mrb[10].mxu0 }
  0xf0   :  { %v681_v7 = vpop.f32.mrb[11].mxu1  ;;  %v368_v8 = vpop.f32.mrb[11].mxu0 }
  0xf5   :  { %v535_v12 = vpop.f32.mrb[12].mxu1  ;;  %v494_v15 = vpop.f32.mrb[12].mxu0 }
  0xf6   :  { %v543_v14 = vmax.f32 %v412_v63, %v535_v12  ;;  %v688_v16 = vpop.f32.mrb[13].mxu1  ;;  %v541_v17 = vmax.f32 %v410_v2, %v494_v15  ;;  %v496_v18 = vpop.f32.mrb[13].mxu0 }
  0xf7   :  { %v538_v19 = vpop.f32.mrb[14].mxu1  ;;  %v542_v23 = vmax.f32 %v411_v5, %v496_v18  ;;  %v498_v24 = vpop.f32.mrb[14].mxu0 }
  0xf8   :  { %v552_v22 = vadd.f32 %v548_v13, %v543_v14  ;;  %v689_v25 = vpop.f32.mrb[15].mxu1  ;;  %v550_v26 = vadd.f32 %v548_v13, %v541_v17  ;;  %v499_v27 = vpop.f32.mrb[15].mxu0 }
  0xf9   :  { %v551_v29 = vadd.f32 %v548_v13, %v542_v23 }
  0xfa   :  { %v555_v28 = vmax.f32 %v552_v22, 0.0  ;;  %v553_v30 = vmax.f32 %v550_v26, 0.0 }
  0xfb   :  { %v554_v33 = vmax.f32 %v551_v29, 0.0 }
  0xfc   :  { %v558_v32 = vpack.c.bf16 %v555_v28, %v555_v28 }
  0xfd   :  { %v645_v34 = vpack.c.bf16 %v554_v33, %v553_v30 }
  0xfe   :  { %v576_v35 = vrot.slane %v558_v32, %v568_v31 }
  0xff   :  { %v569_v36 = vrot.slane %v645_v34, %v568_v31 }
 0x101   :  { %v577_v37 = vcombine.low %v569_v36, %v576_v35 }
 0x103   :  { %584 = vst.msk [vmem:[%s890_s3] sm:$0x3f] %vm583_vm8, %v577_v37 }

// kernel: cnn_femnist_forward.4
= control target key start
LH: loop header
LB: loop body
LE: loop exit
PB: predicated region body
PF: predicated region fallthrough
CT: control target
= control target key end

     0   :  { %v665_v0 = vmov 0.0   ;;  %vm666_vm0 = vmmov 0   ;;  %v667_v4 = vmov 0   ;;  %vm78_vm1 = vcmask 1041408   ;;  %s831_s0 = inlined_call_operand.vmem [shape: bf16[4,100,32], index: 0, kind: input, shape index: {}]   ;;  %s832_s1 = inlined_call_operand.vmem [shape: bf16[12,100], index: 1, kind: input, shape index: {}]   ;;  %s833_s2 = inlined_call_operand.vmem [shape: f32[12,1], index: 2, kind: input, shape index: {}]   ;;  %s834_s3 = inlined_call_operand.vmem [shape: bf16[12,32], index: 3, kind: output, shape index: {}]  }
   0x1   :  { %560 = vmatprep.subr.bf16.mxu0 %v665_v0  ;;  %578 = vmatprep.subr.bf16.mxu1 %v665_v0  ;;  %v636_v1 = vld [vmem:[%s831_s0] sm:$0xff]   ;;  %v637_v2 = vld [vmem:[%s831_s0 + $0x34] sm:$0xff]   ;;  %v638_v3 = vld [vmem:[%s831_s0 + $0x8] sm:$0xff]   ;;  %vm74_vm2 = vcmask 818176   ;;  %vm444_vm3 = vcmask 257024   ;;  %vm446_vm4 = vcmask 254976  }
   0x2   :  { %574 = vmatprep.mubr.msk.bf16.mxu0 %vm666_vm0, %v665_v0  ;;  %592 = vmatprep.mubr.msk.bf16.mxu1 %vm666_vm0, %v665_v0  ;;  %v639_v5 = vld [vmem:[%s831_s0 + $0x3c] sm:$0xff]   ;;  %v640_v6 = vld [vmem:[%s831_s0 + $0x10] sm:$0xff]   ;;  %v641_v7 = vld [vmem:[%s831_s0 + $0x44] sm:$0xff]  }
   0x3   :  { %561 = vmatpush3.bf16.msra.mxu0 %v636_v1  ;;  %635 = vset.pattern.permute.xlu0 %v667_v4  ;;  %v642_v8 = vld [vmem:[%s831_s0 + $0x18] sm:$0xff]   ;;  %v643_v9 = vld [vmem:[%s831_s0 + $0x4c] sm:$0xff]   ;;  %v644_v10 = vld [vmem:[%s831_s0 + $0x20] sm:$0xff]  }
   0x4   :  { %579 = vmatpush3.bf16.msra.mxu1 %v637_v2  ;;  %562 = vmatprep.subr.bf16.mxu0 %v665_v0  ;;  %v645_v11 = vld [vmem:[%s831_s0 + $0x54] sm:$0xff]   ;;  %v646_v12 = vld [vmem:[%s831_s0 + $0x28] sm:$0xff]   ;;  %v648_v13 = vld [vmem:[%s831_s0 + $0x30] ss:$0 sps:$4 sm:$0x33]  }
   0x5   :  { %580 = vmatprep.subr.bf16.mxu1 %v665_v0  ;;  %v649_v14 = vld [vmem:[%s831_s0 + $0x64] ss:$0 sps:$4 sm:$0x33]   ;;  %v647_v15 = vld [vmem:[%s831_s0 + $0x5c] sm:$0xff]   ;;  %v80_v16 = vsel %vm78_vm1, %v648_v13, 0  ;;  %v651_v19 = vld [vmem:[%s831_s0 + $0x68] sm:$0xff]  }
   0x6   :  { %v177_v17 = vsel %vm78_vm1, %v649_v14, 0  ;;  %v650_v18 = vld [vmem:[%s832_s1] sm:$0x3f]   ;;  %v653_v22 = vld [vmem:[%s831_s0 + $0x70] sm:$0xff]   ;;  %v421_v23 = vld [vmem:[%s833_s2 + $0x8] sm:$0xf] }
   0x7   :  { %563 = vmatpush3.bf16.msra.mxu0 %v638_v3  ;;  %v652_v20 = vld [vmem:[%s831_s0 + $0x9c] sm:$0xff]   ;;  %v654_v24 = vld [vmem:[%s831_s0 + $0xa4] sm:$0xff]   ;;  %v656_v26 = vld [vmem:[%s831_s0 + $0xac] sm:$0xff]  }
   0x8   :  { %581 = vmatpush3.bf16.msra.mxu1 %v639_v5  ;;  %564 = vmatprep.subr.bf16.mxu0 %v665_v0  ;;  %v420_v21 = vld [vmem:[%s833_s2] sm:$0xff]  ;;  %v655_v25 = vld [vmem:[%s831_s0 + $0x78] sm:$0xff]   ;;  %v659_v29 = vld [vmem:[%s831_s0 + $0x88] sm:$0xff]  }
   0x9   :  { %582 = vmatprep.subr.bf16.mxu1 %v665_v0  ;;  %424 = vperm.xlu0 %635, %v420_v21   ;;  %v657_v27 = vld [vmem:[%s831_s0 + $0x80] sm:$0xff]   ;;  %v658_v28 = vld [vmem:[%s831_s0 + $0xb4] sm:$0xff]   ;;  %v664_v34 = vld [vmem:[%s831_s0 + $0xcc] ss:$0 sps:$4 sm:$0x33]  }
   0xa   :  { %v660_v30 = vld [vmem:[%s831_s0 + $0xbc] sm:$0xff]   ;;  %v661_v31 = vld [vmem:[%s831_s0 + $0x90] sm:$0xff]   ;;  %v662_v32 = vld [vmem:[%s831_s0 + $0xc4] sm:$0xff]   ;;  %v375_v36 = vsel %vm78_vm1, %v664_v34, 0 }
   0xb   :  { %565 = vmatpush3.bf16.msra.mxu0 %v640_v6  ;;  %v663_v33 = vld [vmem:[%s831_s0 + $0x98] ss:$0 sps:$4 sm:$0x33]  }
   0xc   :  { %583 = vmatpush3.bf16.msra.mxu1 %v641_v7  ;;  %566 = vmatprep.subr.bf16.mxu0 %v665_v0  ;;  %v276_v35 = vsel %vm78_vm1, %v663_v33, 0 }
   0xd   :  { %584 = vmatprep.subr.bf16.mxu1 %v665_v0  ;;  %429 = vperm.xlu0 %635, %v421_v23  }
   0xf   :  { %567 = vmatpush3.bf16.msra.mxu0 %v642_v8 }
  0x10   :  { %585 = vmatpush3.bf16.msra.mxu1 %v643_v9  ;;  %568 = vmatprep.subr.bf16.mxu0 %v665_v0 }
  0x11   :  { %586 = vmatprep.subr.bf16.mxu1 %v665_v0 }
  0x13   :  { %569 = vmatpush3.bf16.msra.mxu0 %v644_v10 }
  0x14   :  { %587 = vmatpush3.bf16.msra.mxu1 %v645_v11  ;;  %570 = vmatprep.subr.bf16.mxu0 %v665_v0 }
  0x15   :  { %588 = vmatprep.subr.bf16.mxu1 %v665_v0 }
  0x17   :  { %571 = vmatpush3.bf16.msra.mxu0 %v646_v12 }
  0x18   :  { %589 = vmatpush3.bf16.msra.mxu1 %v647_v15  ;;  %572 = vmatprep.subr.bf16.mxu0 %v665_v0 }
  0x19   :  { %590 = vmatprep.subr.bf16.mxu1 %v665_v0 }
  0x1b   :  { %573 = vmatpush3.bf16.msra.mxu0 %v80_v16 }
  0x1c   :  { %591 = vmatpush3.bf16.msra.mxu1 %v177_v17  ;;  %596 = vmatprep.subr.bf16.mxu0 %v665_v0 }
  0x1d   :  { %614 = vmatprep.subr.bf16.mxu1 %v665_v0 }
  0x1e   :  { %575 = vmatmul.mubr.msk.bf16.vlgmr.msra.gmra.mrb[0].mxu0 %vm74_vm2, %v650_v18 }
  0x1f   :  { %593 = vmatmul.mubr.msk.bf16.vlgmr.msra.gmra.mrb[0].mxu1 %vm74_vm2, %v650_v18  ;;  %597 = vmatpush3.bf16.msra.mxu0 %v651_v19 }
  0x20   :  { %615 = vmatpush3.bf16.msra.mxu1 %v652_v20  ;;  %598 = vmatprep.subr.bf16.mxu0 %v665_v0 }
  0x21   :  { %616 = vmatprep.subr.bf16.mxu1 %v665_v0  ;;  %610 = vmatprep.mubr.msk.bf16.mxu0 %vm666_vm0, %v665_v0 }
  0x22   :  { %628 = vmatprep.mubr.msk.bf16.mxu1 %vm666_vm0, %v665_v0 }
  0x23   :  { %599 = vmatpush3.bf16.msra.mxu0 %v653_v22 }
  0x24   :  { %617 = vmatpush3.bf16.msra.mxu1 %v654_v24  ;;  %600 = vmatprep.subr.bf16.mxu0 %v665_v0 }
  0x25   :  { %618 = vmatprep.subr.bf16.mxu1 %v665_v0 }
  0x27   :  { %601 = vmatpush3.bf16.msra.mxu0 %v655_v25 }
  0x28   :  { %619 = vmatpush3.bf16.msra.mxu1 %v656_v26  ;;  %602 = vmatprep.subr.bf16.mxu0 %v665_v0 }
  0x29   :  { %620 = vmatprep.subr.bf16.mxu1 %v665_v0 }
  0x2b   :  { %603 = vmatpush3.bf16.msra.mxu0 %v657_v27 }
  0x2c   :  { %621 = vmatpush3.bf16.msra.mxu1 %v658_v28  ;;  %604 = vmatprep.subr.bf16.mxu0 %v665_v0 }
  0x2d   :  { %622 = vmatprep.subr.bf16.mxu1 %v665_v0 }
  0x2f   :  { %605 = vmatpush3.bf16.msra.mxu0 %v659_v29 }
  0x30   :  { %623 = vmatpush3.bf16.msra.mxu1 %v660_v30  ;;  %606 = vmatprep.subr.bf16.mxu0 %v665_v0 }
  0x31   :  { %624 = vmatprep.subr.bf16.mxu1 %v665_v0 }
  0x33   :  { %607 = vmatpush3.bf16.msra.mxu0 %v661_v31 }
  0x34   :  { %625 = vmatpush3.bf16.msra.mxu1 %v662_v32  ;;  %608 = vmatprep.subr.bf16.mxu0 %v665_v0 }
  0x35   :  { %626 = vmatprep.subr.bf16.mxu1 %v665_v0 }
  0x37   :  { %609 = vmatpush3.bf16.msra.mxu0 %v276_v35 }
  0x38   :  { %627 = vmatpush3.bf16.msra.mxu1 %v375_v36 }
  0x3a   :  { %611 = vmatmul.mubr.msk.bf16.vlgmr.msra.gmra.mrb[4].mxu0 %vm74_vm2, %v650_v18 }
  0x3b   :  { %629 = vmatmul.mubr.msk.bf16.vlgmr.msra.gmra.mrb[4].mxu1 %vm74_vm2, %v650_v18 }
  0x88   :  { %v425_v47 = vpop.permute.xlu0 %424 }
  0x8c   :  { %v430_v61 = vpop.permute.xlu0 %429 }
  0xf1   :  { %v116_v37 = vpop.f32.mrb[0].mxu0 }
  0xf2   :  { %v213_v38 = vpop.f32.mrb[0].mxu1  ;;  %v576_v39 = vpop.f32.mrb[1].mxu0 }
  0xf3   :  { %v220_v40 = vmax.f32 %v116_v37, %v213_v38  ;;  %v594_v41 = vpop.f32.mrb[1].mxu1  ;;  %v119_v42 = vpop.f32.mrb[2].mxu0 }
  0xf4   :  { %v216_v43 = vpop.f32.mrb[2].mxu1  ;;  %v577_v44 = vpop.f32.mrb[3].mxu0 }
  0xf5   :  { %v221_v45 = vmax.f32 %v119_v42, %v216_v43  ;;  %v595_v46 = vpop.f32.mrb[3].mxu1 }
 0x10d   :  { %v312_v48 = vpop.f32.mrb[4].mxu0 }
 0x10e   :  { %v319_v49 = vmax.f32 %v220_v40, %v312_v48  ;;  %v411_v50 = vpop.f32.mrb[4].mxu1  ;;  %v612_v51 = vpop.f32.mrb[5].mxu0 }
 0x10f   :  { %v630_v52 = vpop.f32.mrb[5].mxu1  ;;  %v315_v53 = vpop.f32.mrb[6].mxu0 }
 0x110   :  { %v418_v54 = vmax.f32 %v319_v49, %v411_v50  ;;  %v320_v55 = vmax.f32 %v221_v45, %v315_v53  ;;  %v414_v56 = vpop.f32.mrb[6].mxu1  ;;  %v613_v57 = vpop.f32.mrb[7].mxu0 }
 0x111   :  { %v631_v58 = vpop.f32.mrb[7].mxu1 }
 0x112   :  { %v432_v59 = vadd.f32 %v425_v47, %v418_v54  ;;  %v419_v60 = vmax.f32 %v320_v55, %v414_v56 }
 0x114   :  { %v434_v62 = vmax.f32 %v432_v59, 0.0  ;;  %v433_v63 = vadd.f32 %v430_v61, %v419_v60 }
 0x116   :  { %v526_v0 = vpack.c.bf16 %v434_v62, %v434_v62  ;;  %v435_v1 = vmax.f32 %v433_v63, 0.0 }
 0x118   :  { %445 = vst.msk [vmem:[%s834_s3] sm:$0xf] %vm444_vm3, %v526_v0  ;;  %v527_v2 = vpack.c.bf16 %v435_v1, %v435_v1 }
 0x11a   :  { %447 = vst.msk [vmem:[%s834_s3 + $0x4] sm:$0x3] %vm446_vm4, %v527_v2 }

// kernel: cnn_femnist_forward.5
= control target key start
LH: loop header
LB: loop body
LE: loop exit
PB: predicated region body
PF: predicated region fallthrough
CT: control target
= control target key end

     0   :  { %v604_v1 = vmov 0   ;;  %v605_v3 = vmov 0.0   ;;  %v72_v5 = vlaneseq  ;;  %v606_v8 = vmov 1966171168   ;;  %s786_s0 = inlined_call_operand.vmem [shape: bf16[2,192], index: 0, kind: input, shape index: {}]   ;;  %s787_s1 = inlined_call_operand.vmem [shape: bf16[192,120], index: 1, kind: input, shape index: {}]   ;;  %s788_s2 = inlined_call_operand.vmem [shape: f32[1,120], index: 2, kind: input, shape index: {}]   ;;  %s789_s3 = inlined_call_operand.vmem [shape: bf16[120,100], index: 3, kind: input, shape index: {}]   ;;  %s790_s4 = inlined_call_operand.vmem [shape: f32[1,100], index: 4, kind: input, shape index: {}]   ;;  %s791_s5 = inlined_call_operand.vmem [shape: bf16[100,10], index: 5, kind: input, shape index: {}]   ;;  %s792_s6 = inlined_call_operand.vmem [shape: f32[1,10], index: 6, kind: input, shape index: {}]   ;;  %s793_s7 = inlined_call_operand.hbm [shape: f32[2,10], index: 7, kind: output, shape index: {}]  }
   0x1   :  { %v549_v0 = vld [vmem:[%s787_s1] sm:$0xff]   ;;  %160 = vmatprep.subr.bf16.mxu0 %v604_v1  ;;  %v550_v2 = vld [vmem:[%s787_s1 + $0x8] sm:$0xff]   ;;  %506 = vmatprep.subr.bf16.mxu1 %v605_v3  ;;  %v551_v4 = vld [vmem:[%s787_s1 + $0x10] sm:$0xff]   ;;  %v70_v9 = vunpack.c.l.s4 %v606_v8  ;;  %vm156_vm0 = vcmask 523264  }
   0x2   :  { %161 = vmatpush1.bf16.msra.mxu0 %v549_v0  ;;  %v552_v6 = vld [vmem:[%s787_s1 + $0x18] sm:$0xff]   ;;  %v456_v7 = vld.sshfl [vmem:[%s786_s0] sm:$0x11 pattern:$0x75316420]  ;;  %v73_v10 = vshrl.u32 %v72_v5, 7 }
   0x3   :  { %162 = vmatprep.subr.bf16.mxu0 %v604_v1  ;;  %v561_v11 = vld [vmem:[%s789_s3] sm:$0xff]   ;;  %v68_v13 = vcombine.high %v456_v7, %v456_v7  ;;  %v71_v14 = vunpack.c.0.s8 %v70_v9  ;;  %v562_v15 = vld [vmem:[%s789_s3 + $0x8] sm:$0xff]   ;;  %v563_v19 = vld [vmem:[%s789_s3 + $0x10] sm:$0xff]  }
   0x4   :  { %v553_v12 = vld [vmem:[%s787_s1 + $0x20] sm:$0xff]   ;;  %507 = vmatpush3.bf16.msra.mxu1 %v561_v11  ;;  %v554_v17 = vld [vmem:[%s787_s1 + $0x28] sm:$0xff]   ;;  %v555_v20 = vld [vmem:[%s787_s1 + $0x30] sm:$0xff]  }
   0x5   :  { %508 = vmatprep.subr.bf16.mxu1 %v605_v3  ;;  %v74_v16 = vsub.s32 %v71_v14, %v73_v10  ;;  %v564_v21 = vld [vmem:[%s789_s3 + $0x18] sm:$0xff]  }
   0x6   :  { %163 = vmatpush1.bf16.msra.mxu0 %v550_v2 }
   0x7   :  { %164 = vmatprep.subr.bf16.mxu0 %v604_v1  ;;  %v82_v18 = vrot.slane %v68_v13, %v74_v16 }
   0x8   :  { %509 = vmatpush3.bf16.msra.mxu1 %v562_v15 }
   0x9   :  { %510 = vmatprep.subr.bf16.mxu1 %v605_v3  ;;  %469 = vmatprep.mubr.msk.bf16.mxu0 %vm156_vm0, %v82_v18 }
   0xa   :  { %165 = vmatpush1.bf16.msra.mxu0 %v551_v4 }
   0xb   :  { %166 = vmatprep.subr.bf16.mxu0 %v604_v1 }
   0xc   :  { %511 = vmatpush3.bf16.msra.mxu1 %v563_v19 }
   0xd   :  { %512 = vmatprep.subr.bf16.mxu1 %v605_v3 }
   0xe   :  { %167 = vmatpush1.bf16.msra.mxu0 %v552_v6 }
   0xf   :  { %168 = vmatprep.subr.bf16.mxu0 %v604_v1 }
  0x12   :  { %169 = vmatpush1.bf16.msra.mxu0 %v553_v12 }
  0x13   :  { %170 = vmatprep.subr.bf16.mxu0 %v604_v1 }
  0x16   :  { %171 = vmatpush1.bf16.msra.mxu0 %v554_v17 }
  0x17   :  { %172 = vmatprep.subr.bf16.mxu0 %v604_v1 }
  0x18   :  { %12 = vsyncpa [#allocation3], 0  ;;  %v556_v22 = vld [vmem:[%s787_s1 + $0x38] sm:$0xff]   ;;  %513 = vmatpush3.bf16.msra.mxu1 %v564_v21  ;;  %v565_v23 = vld [vmem:[%s789_s3 + $0x20] sm:$0xff]   ;;  %v75_v29 = vrot.slane %v456_v7, %v74_v16  ;;  %vm273_vm1 = vcmask 1043456   ;;  %vm607_vm2 = vmmov 0  }
  0x19   :  { %514 = vmatprep.subr.bf16.mxu1 %v605_v3  ;;  %v557_v24 = vld [vmem:[%s787_s1 + $0x40] sm:$0xff]   ;;  %v566_v25 = vld [vmem:[%s789_s3 + $0x28] sm:$0xff]   ;;  %v559_v27 = vld [vmem:[%s787_s1 + $0x50] sm:$0xff]   ;;  %522 = vmatprep.mubr.msk.bf16.mxu1 %vm607_vm2, %v605_v3  ;;  %vm269_vm3 = vcmask 982016   ;;  %vm382_vm4 = vcmask 1041408   ;;  %vm378_vm5 = vcmask 818176  }
  0x1a   :  { %173 = vmatpush1.bf16.msra.mxu0 %v555_v20  ;;  %v558_v26 = vld [vmem:[%s787_s1 + $0x48] sm:$0xff]   ;;  %v560_v28 = vld [vmem:[%s787_s1 + $0x58] sm:$0xff]   ;;  %v567_v30 = vld [vmem:[%s789_s3 + $0x30] sm:$0xff]   ;;  %vm426_vm6 = vcmask 74752  }
  0x1b   :  { %174 = vmatprep.subr.bf16.mxu0 %v604_v1  ;;  %v568_v31 = vld [vmem:[%s789_s3 + $0x38] ss:$0 sps:$4 sm:$0xff]   ;;  %v455_v33 = vld [vmem:[%s788_s2] ss:$0 sm:$0xff]  ;;  %v570_v42 = vld [vmem:[%s791_s5 + $0x8] sm:$0xff]  }
  0x1c   :  { %515 = vmatpush3.bf16.msra.mxu1 %v565_v23  ;;  %v275_v32 = vsel %vm273_vm1, %v568_v31, 0  ;;  %v569_v40 = vld [vmem:[%s791_s5] sm:$0xff]   ;;  %v571_v43 = vld [vmem:[%s791_s5 + $0x10] sm:$0xff]   ;;  %v572_v44 = vld [vmem:[%s791_s5 + $0x18] sm:$0xff]  }
  0x1d   :  { %516 = vmatprep.subr.bf16.mxu1 %v605_v3  ;;  %v573_v45 = vld [vmem:[%s791_s5 + $0x20] sm:$0xff]   ;;  %v574_v46 = vld [vmem:[%s791_s5 + $0x28] sm:$0xff]   ;;  %v575_v47 = vld [vmem:[%s791_s5 + $0x30] ss:$0 sps:$4 sm:$0x33]  }
  0x1e   :  { %175 = vmatpush1.bf16.msra.mxu0 %v556_v22  ;;  %v384_v48 = vsel %vm382_vm4, %v575_v47, 0  ;;  %v470_v49 = vld [vmem:[%s790_s4] ss:$0 sm:$0xff]  ;;  %s608_s4 = smov [#allocation2]  }
  0x1f   :  { %176 = vmatprep.subr.bf16.mxu0 %v604_v1  ;;  %v480_v57 = vld [vmem:[%s792_s6] ss:$0 sm:$0xff]  ;;  %s447_s5 = sshll.u32 %s608_s4, 4  ;;  %s448_s5 = int_to_ptr.vmem [resolvable:$true] %s447_s5 }
  0x20   :  { %517 = vmatpush3.bf16.msra.mxu1 %v566_v25  ;;  %s580_s6 = scalar_lea.vmem %s448_s5, 32  ;;  %p585_p1 = scmp.lt.s32.totalorder %s448_s5, %s448_s5 }
  0x21   :  { %518 = vmatprep.subr.bf16.mxu1 %v605_v3  ;;  %p581_p0 = scmp.ne.s32.totalorder %s448_s5, %s580_s6  ;;  %p586_p2 = scmp.lt.s32.totalorder %s580_s6, %s580_s6 }
  0x22   :  { %177 = vmatpush1.bf16.msra.mxu0 %v557_v24 }
  0x23   :  { %178 = vmatprep.subr.bf16.mxu0 %v604_v1  ;;  %p587_p3 = por %p586_p2, %p585_p1 }
  0x24   :  { %519 = vmatpush3.bf16.msra.mxu1 %v567_v30 }
  0x25   :  { %520 = vmatprep.subr.bf16.mxu1 %v605_v3  ;;  %p588_p4 = pnand %p587_p3, %p581_p0 }
  0x26   :  { %179 = vmatpush1.bf16.msra.mxu0 %v558_v26 }
  0x27   :  { %180 = vmatprep.subr.bf16.mxu0 %v604_v1 }
  0x28   :  { %521 = vmatpush3.bf16.msra.mxu1 %v275_v32 }
  0x29   :  { %526 = vmatprep.subr.bf16.mxu1 %v605_v3 }
  0x2a   :  { %181 = vmatpush1.bf16.msra.mxu0 %v559_v27 }
  0x2b   :  { %182 = vmatprep.subr.bf16.mxu0 %v604_v1 }
  0x2e   :  { %183 = vmatpush1.bf16.msra.mxu0 %v560_v28 }
  0x31   :  { %193 = vmatmul.mubr.bf16.vlgmr.msra.gmra.mrb[0].mxu0 %v75_v29 }
 0x104   :  { %v194_v34 = vpop.f32.mrb[0].mxu0 }
 0x105   :  { %v195_v35 = vadd.f32 %v455_v33, %v194_v34  ;;  %v196_v36 = vpop.f32.mrb[1].mxu0 }
 0x106   :  { %v197_v37 = vpop.f32.mrb[2].mxu0 }
 0x107   :  { %v200_v38 = vmax.f32 %v195_v35, 0.0  ;;  %v198_v39 = vpop.f32.mrb[3].mxu0 }
 0x109   :  { %v201_v41 = vpack.c.bf16 %v200_v38, %v200_v38 }
 0x10b   :  { %523 = vmatmul.mubr.msk.bf16.vlgmr.msra.gmra.mrb[0].mxu1 %vm269_vm3, %v201_v41 }
 0x10c   :  { %527 = vmatpush3.bf16.msra.mxu1 %v569_v40  ;;  %540 = vmatprep.mubr.msk.bf16.mxu1 %vm607_vm2, %v605_v3 }
 0x10d   :  { %528 = vmatprep.subr.bf16.mxu1 %v605_v3 }
 0x110   :  { %529 = vmatpush3.bf16.msra.mxu1 %v570_v42 }
 0x111   :  { %530 = vmatprep.subr.bf16.mxu1 %v605_v3 }
 0x114   :  { %531 = vmatpush3.bf16.msra.mxu1 %v571_v43 }
 0x115   :  { %532 = vmatprep.subr.bf16.mxu1 %v605_v3 }
 0x118   :  { %533 = vmatpush3.bf16.msra.mxu1 %v572_v44 }
 0x119   :  { %534 = vmatprep.subr.bf16.mxu1 %v605_v3 }
 0x11c   :  { %535 = vmatpush3.bf16.msra.mxu1 %v573_v45 }
 0x11d   :  { %536 = vmatprep.subr.bf16.mxu1 %v605_v3 }
 0x120   :  { %537 = vmatpush3.bf16.msra.mxu1 %v574_v46 }
 0x121   :  { %538 = vmatprep.subr.bf16.mxu1 %v605_v3 }
 0x124   :  { %539 = vmatpush3.bf16.msra.mxu1 %v384_v48 }
 0x1de   :  { %v311_v50 = vpop.f32.mrb[0].mxu1 }
 0x1df   :  { %v312_v51 = vadd.f32 %v470_v49, %v311_v50  ;;  %v524_v52 = vpop.f32.mrb[1].mxu1 }
 0x1e0   :  { %v314_v53 = vpop.f32.mrb[2].mxu1 }
 0x1e1   :  { %v317_v54 = vmax.f32 %v312_v51, 0.0  ;;  %v525_v55 = vpop.f32.mrb[3].mxu1 }
 0x1e3   :  { %v318_v56 = vpack.c.bf16 %v317_v54, %v317_v54 }
 0x1e5   :  { %541 = vmatmul.mubr.msk.bf16.vlgmr.msra.gmra.mrb[4].mxu1 %vm378_vm5, %v318_v56 }
 0x2b8   :  { %v420_v58 = vpop.f32.mrb[4].mxu1 }
 0x2b9   :  { %v421_v59 = vadd.f32 %v480_v57, %v420_v58  ;;  %v542_v60 = vpop.f32.mrb[5].mxu1 }
 0x2ba   :  { %v423_v61 = vpop.f32.mrb[6].mxu1 }
 0x2bb   :  { %v543_v62 = vpop.f32.mrb[7].mxu1  ;;  %v427_v63 = vsel %vm426_vm6, %v421_v59, -inf }
 0x2bc   :  { %428 = vmax.xlane.f32.xlu0 %v427_v63 }
 0x349   :  { %v429_v0 = vpop.xlane.xlu0 %428 }
 0x34a   :  { %v430_v1 = vsub.f32 %v421_v59, %v429_v0 }
 0x34c   :  { %v431_v2 = vmul.f32 1.442695, %v430_v1 }
 0x34e   :  { %576 = vpow2.f32 %v431_v2 }
 0x358   :  { %v577_v3 = vpop.eup %576 }
 0x359   :  { %v433_v4 = vsel %vm426_vm6, %v577_v3, 0.0 }
 0x35a   :  { %434 = vadd.xlane.f32.xlu0 %v433_v4 }
 0x3e7   :  { %v435_v5 = vpop.xlane.xlu0 %434 }
 0x3e8   :  { %578 = vlog2.f32 %v435_v5 }
 0x3f2   :  { %v579_v6 = vpop.eup %578 }
 0x3f3   :  { %v437_v7 = vmul.f32 0.6931472, %v579_v6 }
 0x3f5   :  { %v438_v8 = vadd.f32 %v437_v7, %v429_v0 }
 0x3f7   :  { %v439_v9 = vsub.f32 %v421_v59, %v438_v8 }
 0x3f9   :  { %440 = vst.msk [vmem:[#allocation2] sm:$0x3] %vm426_vm6, %v439_v9 }
 0x3fa   :  { %591 = shalt.err (!%p588_p4)
}
 0x3fb   :  { %s592_s14 = scalar_lea.hbm %s793_s7, 32 }
 0x3fc   :  { %p593_p5 = scmp.ne.s32.totalorder %s793_s7, %s592_s14  ;;  %p596_p6 = scmp.lt.u32.totalorder %s592_s14, %s793_s7 }
 0x3fe   :  { %p598_p7 = pnand %p596_p6, %p593_p5 }
 0x400   :  { %601 = shalt.err (!%p598_p7)
}
 0x401   :  { %450 = dma.vmem_to_hbm [thread:$0]  %s448_s5, 32, %s793_s7, [#allocation3]  }
 0x402   :  { %602 = dma.done.wait [#allocation3], 32  }
 0x403   :  { %603 = vsyncadd [#allocation3], 4294967264 }
 0x404   :  { %454 = vsyncpa [#allocation3], 1 }

</bundles_post_ra>
